<compile_context>
chip_gen: v5e
topology: v5e:2x2
jax: 0.10.0
libtpu: 0.0.40
codegen_flags: <defaults>
</compile_context>

<pallas_src>
import numpy as np
import jax
import jax.numpy as jnp
from jax.experimental import pallas as pl
from jax.experimental.pallas import tpu as pltpu

_LANES = 128            # vreg lane width
_SUBLANES = 8           # vreg sublane depth (32-bit)
_MAX_FOLD_GROUPS = 64   # bounds the statically-unrolled per-step fold chain


# ----------------------------------------------------------------------------
# Small planning helpers
# ----------------------------------------------------------------------------
def _round_up(x, m):
    return ((int(x) + m - 1) // m) * m


def _round_down(x, m):
    return max(m, (int(x) // m) * m)


def _sublane_quantum(itemsize):
    # Sub-32-bit dtypes pack along sublanes: 8 rows for 32-bit, 16 for bf16,
    # 32 for int8 / fp8.
    return _SUBLANES * max(1, 4 // max(1, int(itemsize)))


def _vmem_plan():
    """Per-generation VMEM budgets (v5e/v6e: 128 MiB, v7x: 64 MiB per TC)."""
    try:
        cap = int(pltpu.get_tpu_info().vmem_capacity_bytes)
    except Exception:  # interpret mode / unexpected backend
        cap = 64 * 1024 * 1024
    vmem_limit = int(min(cap // 2, 64 * 1024 * 1024))          # 64 MiB / 32 MiB
    block_budget = int(max(2 * 1024 * 1024,
                           min(8 * 1024 * 1024, cap // 16)))   # 8 MiB / 4 MiB
    return vmem_limit, block_budget


def _plan_dim(total, quantum, cap_elems):
    """Tile one dimension.  Returns (tile, padded_total).

    * total <= cap       -> single full-extent block dim (always legal), no pad.
    * divisor tile found -> largest multiple-of-quantum divisor in [cap/2, cap]
                            (no padding -> no extra HBM copy).
    * otherwise          -> cap-sized tile; operand is zero-padded to a multiple
                            (sum-neutral) instead of a huge full-extent block.
    """
    total = int(total)
    cap = max(quantum, (int(cap_elems) // quantum) * quantum)
    if total <= cap:
        return total, total
    t = cap
    floor = max(quantum, cap // 2)
    while t >= floor:
        if total % t == 0:
            return t, total
        t -= quantum
    return cap, _round_up(total, cap)


def _maybe_split_parallel(total, tile, quantum):
    """Prefer >= 2 blocks along the 'parallel' kept-axis grid dim (v7x has two
    TensorCores) when that costs no padding and stays layout-legal."""
    if (tile == total and total % 2 == 0
            and (total // 2) % quantum == 0 and total // 2 >= quantum):
        return total // 2
    return tile


def _collapse_runs(shape, reduced):
    """Merge contiguous kept / reduced dims into runs of (is_reduced, size)."""
    runs = []
    for d, s in enumerate(shape):
        flag = d in reduced
        if runs and runs[-1][0] == flag:
            runs[-1][1] *= int(s)
        else:
            runs.append([flag, int(s)])
    return [(f, s) for f, s in runs]


def _tree_sum(parts):
    """Pairwise tree-fold (better ILP than a serial add chain)."""
    while len(parts) > 1:
        nxt = [parts[i] + parts[i + 1] for i in range(0, len(parts) - 1, 2)]
        if len(parts) % 2:
            nxt.append(parts[-1])
        parts = nxt
    return parts[0]


# ----------------------------------------------------------------------------
# Kernels
# ----------------------------------------------------------------------------
def _make_lanes_kernel(tile_k, group):
    """(R, K) slab, reduction axis K on lanes.  Per-group f32 casts + VPU folds
    into a resident accumulator; one cross-lane reduce + bias at the last step."""
    n_groups = tile_k // group

    def kernel(a_ref, b_ref, o_ref, acc_ref):
        k = pl.program_id(1)

        @pl.when(k == 0)
        def _init():
            acc_ref[...] = jnp.zeros_like(acc_ref)

        parts = [a_ref[:, g * group:(g + 1) * group].astype(jnp.float32)
                 for g in range(n_groups)]
        acc_ref[...] = acc_ref[...] + _tree_sum(parts)

        @pl.when(k == pl.num_programs(1) - 1)
        def _finalize():
            total = jnp.sum(acc_ref[...], axis=-1, keepdims=True)
            o_ref[...] = (total + b_ref[...].astype(jnp.float32)).astype(o_ref.dtype)

    return kernel


def _make_sublanes_kernel(tile_k, group):
    """(K, R) slab, reduction axis K on sublanes; kept axis R lane-dense."""
    n_groups = tile_k // group

    def kernel(a_ref, b_ref, o_ref, acc_ref):
        k = pl.program_id(1)

        @pl.when(k == 0)
        def _init():
            acc_ref[...] = jnp.zeros_like(acc_ref)

        parts = [a_ref[g * group:(g + 1) * group, :].astype(jnp.float32)
                 for g in range(n_groups)]
        acc_ref[...] = acc_ref[...] + _tree_sum(parts)

        @pl.when(k == pl.num_programs(1) - 1)
        def _finalize():
            total = jnp.sum(acc_ref[...], axis=0, keepdims=True)
            o_ref[...] = (total + b_ref[...].astype(jnp.float32)).astype(o_ref.dtype)

    return kernel


def _make_middle_kernel(tile_k, group):
    """(A, K, B) slab, reduction over the middle axis K; B stays lane-dense."""
    n_groups = tile_k // group

    def kernel(a_ref, b_ref, o_ref, acc_ref):
        k = pl.program_id(2)

        @pl.when(k == 0)
        def _init():
            acc_ref[...] = jnp.zeros_like(acc_ref)

        parts = [a_ref[:, g * group:(g + 1) * group, :].astype(jnp.float32)
                 for g in range(n_groups)]
        acc_ref[...] = acc_ref[...] + _tree_sum(parts)

        @pl.when(k == pl.num_programs(2) - 1)
        def _finalize():
            total = jnp.sum(acc_ref[...], axis=1)
            o_ref[...] = (total + b_ref[...].astype(jnp.float32)).astype(o_ref.dtype)

    return kernel


# ----------------------------------------------------------------------------
# Reduction paths (planning + pallas_call)
# ----------------------------------------------------------------------------
def _reduce_trailing(a2, b_col, out_dtype, vmem_limit, block_budget):
    """(R, K) slab, reduce trailing K (lanes)."""
    R, K = (int(s) for s in a2.shape)
    itemsize = int(a2.dtype.itemsize)
    rq = _sublane_quantum(itemsize)
    budget = max(block_budget // itemsize, rq * _LANES)

    # Reduction axis K on lanes -> long contiguous DMA rows.
    k_cap = min(_MAX_FOLD_GROUPS * _LANES,
                max(_LANES, _round_down(budget // min(max(R, 1), 512), _LANES)))
    tile_k, K_pad = _plan_dim(K, _LANES, k_cap)
    group_k = _LANES if tile_k % _LANES == 0 else tile_k

    # Kept axis R on sublanes: spend the remaining block budget here.
    r_cap = max(rq, _round_down(budget // tile_k, rq))
    tile_r, R_pad = _plan_dim(R, rq, r_cap)
    tile_r = _maybe_split_parallel(R_pad, tile_r, rq)

    a_p = a2
    if (R_pad, K_pad) != (R, K):
        a_p = jnp.pad(a2, ((0, R_pad - R), (0, K_pad - K)))       # zeros are sum-neutral
    b_p = b_col if R_pad == R else jnp.pad(b_col, ((0, R_pad - R), (0, 0)))

    out = pl.pallas_call(
        _make_lanes_kernel(tile_k, group_k),
        out_shape=jax.ShapeDtypeStruct((R_pad, 1), out_dtype),
        grid_spec=pltpu.PrefetchScalarGridSpec(
            num_scalar_prefetch=0,
            grid=(R_pad // tile_r, K_pad // tile_k),
            in_specs=[pl.BlockSpec((tile_r, tile_k), lambda r, k: (r, k)),
                      pl.BlockSpec((tile_r, 1), lambda r, k: (r, 0))],
            out_specs=pl.BlockSpec((tile_r, 1), lambda r, k: (r, 0)),
            scratch_shapes=[pltpu.VMEM((tile_r, group_k), jnp.float32)],
        ),
        compiler_params=pltpu.CompilerParams(
            dimension_semantics=("parallel", "arbitrary"),
            vmem_limit_bytes=vmem_limit),
        cost_estimate=pl.CostEstimate(
            flops=R_pad * K_pad, transcendentals=0,
            bytes_accessed=R_pad * K_pad * itemsize
                           + R_pad * int(b_col.dtype.itemsize)
                           + R_pad * int(np.dtype(out_dtype).itemsize)),
    )(a_p, b_p)
    return out[:R, 0]


def _reduce_leading(a2, b_row, out_dtype, vmem_limit, block_budget):
    """(K, R) slab, reduce leading K (sublanes); kept axis R lane-dense."""
    K, R = (int(s) for s in a2.shape)
    itemsize = int(a2.dtype.itemsize)
    kq = _sublane_quantum(itemsize)
    budget = max(block_budget // itemsize, kq * _LANES)

    # Kept axis R on lanes: lane-dense output / bias, long contiguous DMA rows.
    r_cap = max(_LANES, _round_down(budget // min(max(K, 1), 8 * kq), _LANES))
    tile_r, R_pad = _plan_dim(R, _LANES, r_cap)
    tile_r = _maybe_split_parallel(R_pad, tile_r, _LANES)

    # Reduction axis K on sublanes.
    k_cap = min(_MAX_FOLD_GROUPS * kq, max(kq, _round_down(budget // tile_r, kq)))
    tile_k, K_pad = _plan_dim(K, kq, k_cap)
    group_k = kq if tile_k % kq == 0 else tile_k

    a_p = a2
    if (K_pad, R_pad) != (K, R):
        a_p = jnp.pad(a2, ((0, K_pad - K), (0, R_pad - R)))
    b_p = b_row if R_pad == R else jnp.pad(b_row, ((0, 0), (0, R_pad - R)))

    out = pl.pallas_call(
        _make_sublanes_kernel(tile_k, group_k),
        out_shape=jax.ShapeDtypeStruct((1, R_pad), out_dtype),
        grid_spec=pltpu.PrefetchScalarGridSpec(
            num_scalar_prefetch=0,
            grid=(R_pad // tile_r, K_pad // tile_k),
            in_specs=[pl.BlockSpec((tile_k, tile_r), lambda r, k: (k, r)),
                      pl.BlockSpec((1, tile_r), lambda r, k: (0, r))],
            out_specs=pl.BlockSpec((1, tile_r), lambda r, k: (0, r)),
            scratch_shapes=[pltpu.VMEM((group_k, tile_r), jnp.float32)],
        ),
        compiler_params=pltpu.CompilerParams(
            dimension_semantics=("parallel", "arbitrary"),
            vmem_limit_bytes=vmem_limit),
        cost_estimate=pl.CostEstimate(
            flops=R_pad * K_pad, transcendentals=0,
            bytes_accessed=R_pad * K_pad * itemsize
                           + R_pad * int(b_row.dtype.itemsize)
                           + R_pad * int(np.dtype(out_dtype).itemsize)),
    )(a_p, b_p)
    return out[0, :R]


def _reduce_middle(a3, b2, out_dtype, vmem_limit, block_budget):
    """(A, K, B) slab, reduce the middle K via a 3-D grid; no HBM transpose."""
    A, K, B = (int(s) for s in a3.shape)
    itemsize = int(a3.dtype.itemsize)
    kq = _sublane_quantum(itemsize)
    budget = max(block_budget // itemsize, kq * _LANES)

    # Small leading-kept tile that divides A exactly (never forces a pad copy).
    ta = 1
    for d in range(min(A, 8), 0, -1):
        if A % d == 0:
            ta = d
            break

    # Kept axis B on lanes.
    b_cap = max(_LANES, _round_down(budget // (ta * min(max(K, 1), 8 * kq)), _LANES))
    tb, B_pad = _plan_dim(B, _LANES, b_cap)

    # Reduction axis K on sublanes.
    k_cap = min(_MAX_FOLD_GROUPS * kq, max(kq, _round_down(budget // (ta * tb), kq)))
    tk, K_pad = _plan_dim(K, kq, k_cap)
    group_k = kq if tk % kq == 0 else tk

    a_p = a3
    if (K_pad, B_pad) != (K, B):
        a_p = jnp.pad(a3, ((0, 0), (0, K_pad - K), (0, B_pad - B)))
    b_p = b2 if B_pad == B else jnp.pad(b2, ((0, 0), (0, B_pad - B)))

    out = pl.pallas_call(
        _make_middle_kernel(tk, group_k),
        out_shape=jax.ShapeDtypeStruct((A, B_pad), out_dtype),
        grid_spec=pltpu.PrefetchScalarGridSpec(
            num_scalar_prefetch=0,
            grid=(A // ta, B_pad // tb, K_pad // tk),
            in_specs=[pl.BlockSpec((ta, tk, tb), lambda a, b, k: (a, k, b)),
                      pl.BlockSpec((ta, tb), lambda a, b, k: (a, b))],
            out_specs=pl.BlockSpec((ta, tb), lambda a, b, k: (a, b)),
            scratch_shapes=[pltpu.VMEM((ta, group_k, tb), jnp.float32)],
        ),
        compiler_params=pltpu.CompilerParams(
            dimension_semantics=("parallel", "parallel", "arbitrary"),
            vmem_limit_bytes=vmem_limit),
        cost_estimate=pl.CostEstimate(
            flops=A * K_pad * B_pad, transcendentals=0,
            bytes_accessed=A * K_pad * B_pad * itemsize
                           + A * B_pad * int(b2.dtype.itemsize)
                           + A * B_pad * int(np.dtype(out_dtype).itemsize)),
    )(a_p, b_p)
    return out[:, :B]


# ----------------------------------------------------------------------------
# Public wrapper (TorchAddNet.forward)
# ----------------------------------------------------------------------------
def torch_add_net(input_a, input_b, indices, keep_dims=False):
    """Pallas implementation of TorchAddNet.forward.

    Reduction axes (and thus the output shape) must be static in JAX, so
    relu(indices) is evaluated host-side, mirroring torch's .tolist()."""
    input_a = jnp.asarray(input_a)
    input_b = jnp.asarray(input_b)
    idx = np.asarray(indices).reshape(-1).tolist()
    relu_idx = [int(max(int(i), 0)) for i in idx]                # torch.relu(indices)
    ndim = input_a.ndim

    if len(set(relu_idx)) != len(relu_idx):
        raise ValueError(f"dim appears multiple times in reduction dims {relu_idx}")
    if any(d >= ndim for d in relu_idx):
        raise ValueError(f"reduction dim out of range for rank-{ndim} input: {relu_idx}")

    axes = sorted(relu_idx)
    out_dtype = jnp.result_type(input_a.dtype, input_b.dtype)

    if not axes:
        # TODO(synk): torch's legacy empty-dim-list behavior is ambiguous; treat as no reduction.
        return input_a.astype(out_dtype) + input_b.astype(out_dtype)

    kept = [d for d in range(ndim) if d not in axes]
    kept_shape = tuple(int(input_a.shape[d]) for d in kept)
    keepdim_shape = tuple(1 if d in axes else int(input_a.shape[d]) for d in range(ndim))
    reduce_shape = keepdim_shape if keep_dims else kept_shape

    # torch's `reduce_a + input_b` broadcasts BOTH operands.  Fuse the bias in
    # the kernel only when it does not expand the output beyond the reduce shape.
    fuse_bias = tuple(np.broadcast_shapes(reduce_shape, tuple(input_b.shape))) == tuple(reduce_shape)
    if fuse_bias:
        bias = jnp.broadcast_to(input_b, reduce_shape).reshape(kept_shape).astype(out_dtype)
    else:
        bias = jnp.zeros(kept_shape, out_dtype)          # real bias added outside the kernel

    vmem_limit, block_budget = _vmem_plan()

    # Collapse contiguous kept / reduced runs (e.g. axes [1, 2] of a 4-D tensor
    # become one middle run) before deciding the data layout.
    runs = _collapse_runs(input_a.shape, set(axes))
    flags = [f for f, _ in runs]
    sizes = [s for _, s in runs]

    if flags.count(True) == 1:
        i_red = flags.index(True)
        pre = int(np.prod(sizes[:i_red], dtype=np.int64)) if i_red > 0 else 1
        red = int(sizes[i_red])
        post = int(np.prod(sizes[i_red + 1:], dtype=np.int64)) if i_red + 1 < len(sizes) else 1
        if post == 1:        # trailing (or full) reduction -> free reshape
            out_flat = _reduce_trailing(input_a.reshape(pre, red), bias.reshape(pre, 1),
                                        out_dtype, vmem_limit, block_budget)
        elif pre == 1:       # leading reduction -> free reshape, kept axis lane-dense
            out_flat = _reduce_leading(input_a.reshape(red, post), bias.reshape(1, post),
                                       out_dtype, vmem_limit, block_budget)
        else:                # single middle reduced run -> 3-D grid, no HBM transpose
            out_flat = _reduce_middle(input_a.reshape(pre, red, post), bias.reshape(pre, post),
                                      out_dtype, vmem_limit, block_budget)
    else:
        # TODO(synk): >=2 interleaved reduced runs — express via a multi-D grid/index_map
        # over the original layout instead of this extra HBM transpose copy.
        K = int(np.prod([int(input_a.shape[d]) for d in axes], dtype=np.int64))
        R = int(np.prod(kept_shape, dtype=np.int64)) if kept_shape else 1
        a2 = jnp.transpose(input_a, tuple(axes) + tuple(kept)).reshape(K, R)
        out_flat = _reduce_leading(a2, bias.reshape(1, R), out_dtype, vmem_limit, block_budget)

    result = out_flat.reshape(reduce_shape)
    if not fuse_bias:
        result = result + input_b.astype(out_dtype)      # torch-style two-sided broadcast
    return result


# ----------------------------------------------------------------------------
# Demo / self-test
# ----------------------------------------------------------------------------
if __name__ == "__main__":
    key = jax.random.PRNGKey(0)
    ka, kb, kc, kd = jax.random.split(key, 4)

    # Shapes consistent with the module's forward: input_a (B=2, C=4, H=16, W=16).
    input_a = jax.random.normal(ka, (2, 4, 16, 16), dtype=jnp.float32)

    # 1) Trailing reduction axes: sum over [2, 3] -> (2, 4), bias (2, 4).
    input_b = jax.random.normal(kb, (2, 4), dtype=jnp.float32)
    indices = np.array([2, 3], dtype=np.int32)
    out = jax.block_until_ready(torch_add_net(input_a, input_b, indices))
    ref = jnp.sum(input_a, axis=(2, 3)) + input_b
    assert out.shape == ref.shape, (out.shape, ref.shape)
    np.testing.assert_allclose(np.asarray(out), np.asarray(ref), rtol=1e-5, atol=1e-4)

    # 2) Leading reduction axes via relu of a negative index: relu([-3, 1]) == [0, 1].
    input_b2 = jax.random.normal(kc, (16, 16), dtype=jnp.float32)
    indices2 = np.array([-3, 1], dtype=np.int32)
    out2 = jax.block_until_ready(torch_add_net(input_a, input_b2, indices2))
    ref2 = jnp.sum(input_a, axis=(0, 1)) + input_b2
    assert out2.shape == ref2.shape, (out2.shape, ref2.shape)
    np.testing.assert_allclose(np.asarray(out2), np.asarray(ref2), rtol=1e-5, atol=1e-4)

    # 3) Middle reduction axis (no HBM transpose path): sum over [1] -> (2, 16, 16).
    input_b3 = jax.random.normal(kd, (2, 16, 16), dtype=jnp.float32)
    indices3 = np.array([1], dtype=np.int32)
    out3 = jax.block_until_ready(torch_add_net(input_a, input_b3, indices3))
    ref3 = jnp.sum(input_a, axis=1) + input_b3
    assert out3.shape == ref3.shape, (out3.shape, ref3.shape)
    np.testing.assert_allclose(np.asarray(out3), np.asarray(ref3), rtol=1e-5, atol=1e-4)

    print("KERNEL_OK")
</pallas_src>

<mosaic_0001>
module attributes {stable_mosaic.version = 11 : i64} {
  func.func @kernel(%arg0: i32, %arg1: i32, %arg2: memref<8x256xf32, #tpu.memory_space<vmem>>, %arg3: memref<8x1xf32, #tpu.memory_space<vmem>>, %arg4: memref<8x1xf32, #tpu.memory_space<vmem>>, %arg5: memref<8x128xf32, #tpu.memory_space<vmem>>) attributes {dimension_semantics = [#tpu.dimension_semantics<parallel>, #tpu.dimension_semantics<arbitrary>], iteration_bounds = array<i64: 1, 1>, scalar_prefetch = 0 : i64, scratch_operands = 1 : i64, tpu.core_type = #tpu.core_type<tc>, window_params = [{transform_indices = @transform_0, window_bounds = array<i64: 8, 256>}, {transform_indices = @transform_1, window_bounds = array<i64: 8, 1>}, {transform_indices = @transform_2, window_bounds = array<i64: 8, 1>}]} {
    %c0_i32 = arith.constant 0 : i32
    %0 = arith.cmpi eq, %arg1, %c0_i32 : i32
    %1 = arith.extui %0 : i1 to i32
    %c0_i32_0 = arith.constant 0 : i32
    %2 = arith.cmpi ne, %1, %c0_i32_0 : i32
    scf.if %2 {
      %cst = arith.constant 0.000000e+00 : f32
      %12 = vector.broadcast %cst : f32 to vector<8x128xf32>
      %c0_9 = arith.constant 0 : index
      %c0_10 = arith.constant 0 : index
      %13 = vector.load %arg5[%c0_9, %c0_10] : memref<8x128xf32, #tpu.memory_space<vmem>>, vector<8x128xf32>
      tpu.vector_store %arg5[%c0_9, %c0_10], %12 {strides = array<i32>} : memref<8x128xf32, #tpu.memory_space<vmem>>, vector<8x128xf32>,
    } else {
    }
    %c0 = arith.constant 0 : index
    %c0_1 = arith.constant 0 : index
    %3 = vector.load %arg2[%c0, %c0_1] : memref<8x256xf32, #tpu.memory_space<vmem>>, vector<8x128xf32>
    %c0_2 = arith.constant 0 : index
    %c128 = arith.constant 128 : index
    %4 = vector.load %arg2[%c0_2, %c128] : memref<8x256xf32, #tpu.memory_space<vmem>>, vector<8x128xf32>
    %c0_3 = arith.constant 0 : index
    %c0_4 = arith.constant 0 : index
    %5 = vector.load %arg5[%c0_3, %c0_4] : memref<8x128xf32, #tpu.memory_space<vmem>>, vector<8x128xf32>
    %6 = arith.addf %3, %4 : vector<8x128xf32>
    %7 = arith.addf %5, %6 : vector<8x128xf32>
    %c0_5 = arith.constant 0 : index
    %c0_6 = arith.constant 0 : index
    %8 = vector.load %arg5[%c0_5, %c0_6] : memref<8x128xf32, #tpu.memory_space<vmem>>, vector<8x128xf32>
    tpu.vector_store %arg5[%c0_5, %c0_6], %7 {strides = array<i32>} : memref<8x128xf32, #tpu.memory_space<vmem>>, vector<8x128xf32>,
    %c0_i32_7 = arith.constant 0 : i32
    %9 = arith.cmpi eq, %arg1, %c0_i32_7 : i32
    %10 = arith.extui %9 : i1 to i32
    %c0_i32_8 = arith.constant 0 : i32
    %11 = arith.cmpi ne, %10, %c0_i32_8 : i32
    scf.if %11 {
      %c0_9 = arith.constant 0 : index
      %c0_10 = arith.constant 0 : index
      %12 = vector.load %arg5[%c0_9, %c0_10] : memref<8x128xf32, #tpu.memory_space<vmem>>, vector<8x128xf32>
      %cst = arith.constant dense<0.000000e+00> : vector<8xf32>
      %13 = vector.multi_reduction <add>, %12, %cst [1] : vector<8x128xf32> to vector<8xf32>
      %14 = vector.shape_cast %13 : vector<8xf32> to vector<8x1xf32>
      %c0_11 = arith.constant 0 : index
      %c0_12 = arith.constant 0 : index
      %15 = vector.load %arg3[%c0_11, %c0_12] : memref<8x1xf32, #tpu.memory_space<vmem>>, vector<8x1xf32>
      %16 = arith.addf %14, %15 : vector<8x1xf32>
      %c0_13 = arith.constant 0 : index
      %c0_14 = arith.constant 0 : index
      %17 = vector.load %arg4[%c0_13, %c0_14] : memref<8x1xf32, #tpu.memory_space<vmem>>, vector<8x1xf32>
      tpu.vector_store %arg4[%c0_13, %c0_14], %16 {strides = array<i32>} : memref<8x1xf32, #tpu.memory_space<vmem>>, vector<8x1xf32>,
    } else {
    }
    return
  }
  func.func @transform_0(%arg0: i32, %arg1: i32) -> (i32, i32) {
    %c0_i32 = arith.constant 0 : i32
    return %arg0, %arg1 : i32, i32
  }
  func.func @transform_1(%arg0: i32, %arg1: i32) -> (i32, i32) {
    %c0_i32 = arith.constant 0 : i32
    %c0_i32_0 = arith.constant 0 : i32
    return %arg0, %c0_i32 : i32, i32
  }
  func.func @transform_2(%arg0: i32, %arg1: i32) -> (i32, i32) {
    %c0_i32 = arith.constant 0 : i32
    %c0_i32_0 = arith.constant 0 : i32
    return %arg0, %c0_i32 : i32, i32
  }
}

</mosaic_0001>

<bundles_post_ra>
// kernel: tpu_custom_call.1
= control target key start
LH: loop header
LB: loop body
LE: loop exit
PB: predicated region body
PF: predicated region fallthrough
CT: control target
= control target key end

     0   :  { %7 = vsyncpa [#allocation4], 0  ;;  %s78_s12 = smov [#allocation3]   ;;  %s103_s0 = inlined_call_operand.hbm [shape: f32[8,256], index: 0, kind: input, shape index: {}]   ;;  %s104_s1 = inlined_call_operand.vmem [shape: f32[8,1], index: 1, kind: input, shape index: {}]   ;;  %s105_s2 = inlined_call_operand.vmem [shape: f32[8,1], index: 2, kind: output, shape index: {}]  }
   0x1   :  { %s13_s11 = sshll.u32 %s103_s0, 4  ;;  %s15_s13 = sshll.u32 %s78_s12, 4  ;;  %s14_s11 = int_to_ptr.hbm [resolvable:$true] %s13_s11  ;;  %s16_s13 = int_to_ptr.vmem [resolvable:$true] %s15_s13 }
   0x2   :  { %18 = dma.hbm_to_vmem [thread:$0]  %s14_s11, 256, %s16_s13, [#allocation4]  }
   0x3   :  { %76 = dma.done.wait [#allocation4], 256  }
   0x4   :  { %77 = vsyncadd [#allocation4], 4294967040  ;;  %v30_v0 = vld [vmem:[#allocation3] sm:$0xff]  ;;  %v31_v1 = vld [vmem:[#allocation3 + $0x8] sm:$0xff]  ;;  %vm44_vm0 = vcmask 7168  }
   0x5   :  { %v33_v2 = vadd.f32 %v31_v1, %v30_v0  ;;  %v42_v3 = vld [vmem:[%s104_s1] sm:$0xff] }
   0x7   :  { %40 = vadd.xlane.f32.xlu0 %v33_v2 }
  0x7a   :  { %v41_v4 = vpop.xlane.xlu0 %40 }
  0x7b   :  { %v43_v5 = vadd.f32 %v42_v3, %v41_v4 }
  0x7d   :  { %45 = vst.msk [vmem:[%s105_s2] sm:$0xff] %vm44_vm0, %v43_v5 }
  0x7e   :  { %50 = vsyncpa [#allocation4], 1 }

</bundles_post_ra>
